<compile_context>
chip_gen: v6e
topology: v6e:2x2x1
jax: 0.10.0
libtpu: 0.0.40
codegen_flags: <defaults>
</compile_context>

<pallas_src>
import functools

import jax
import jax.numpy as jnp
from jax import lax
from jax.experimental import pallas as pl
from jax.experimental.pallas import tpu as pltpu

_LANES = 128
_VMEM_LIMIT = 32 * 1024 * 1024     # within scoped defaults on v5e/v6e and v7x


def _round_up(x, m):
    return ((x + m - 1) // m) * m


# ----------------------- fused encoder (single kernel) ----------------------

def _encoder_kernel(xph_ref, w1_ref, b1_ref, w2_ref, b2_ref, wf_ref, bf_ref,
                    o_ref, *, H2, W2, Hq, cin, c1, c2):
    """conv1(3x3,s2) -> ReLU -> conv2(3x3,s2) -> ReLU -> global-avg-pool -> fc.

    One batch element per grid step; all intermediates stay in VMEM/vregs.

    xph_ref holds a stride-4 space-to-depth view of the pad=1 input:
        xph[(a*4+b)*Hq + m, n, c] == x_pad[4m + a, 4n + b, c]
    so every 3x3/stride-2 patch below is a *static contiguous* slice.
    """
    S = H2 * W2

    # conv1, computed directly in its four stride-2 output quarters: quarter
    # (pi, pj) holds h1 pixels (2m + pi, 2n + pj).  This makes conv2's gathers
    # static contiguous slices as well (no strided access anywhere).
    quarters = {}
    for pi in (0, 1):
        for pj in (0, 1):
            acc = jnp.zeros((S, c1), jnp.float32)
            for di in range(3):
                for dj in range(3):
                    rr, cc = 2 * pi + di, 2 * pj + dj
                    a, ro = rr % 4, rr // 4
                    bb, co = cc % 4, cc // 4
                    base = (a * 4 + bb) * Hq
                    slab = xph_ref[0, base + ro:base + ro + H2,
                                   co:co + W2, :]            # (H2, W2, cin)
                    acc += jnp.dot(slab.reshape(S, cin),
                                   w1_ref[di * 3 + dj],
                                   preferred_element_type=jnp.float32)
            h = jnp.maximum(acc + b1_ref[...], 0.0)
            quarters[(pi, pj)] = h.reshape(H2, W2, c1)

    # conv2 + ReLU accumulated straight from the VMEM-resident quarters
    # (h1 never leaves VMEM).
    acc2 = jnp.zeros((S, c2), jnp.float32)
    for di in range(3):
        for dj in range(3):
            q = quarters[((di + 1) % 2, (dj + 1) % 2)]
            if di == 0:     # needs h1 row 2*i2 - 1: shift down, zero top row
                q = jnp.concatenate(
                    [jnp.zeros((1, W2, c1), q.dtype), q[:H2 - 1]], axis=0)
            if dj == 0:     # needs h1 col 2*j2 - 1: shift right, zero left col
                q = jnp.concatenate(
                    [jnp.zeros((H2, 1, c1), q.dtype), q[:, :W2 - 1]], axis=1)
            acc2 += jnp.dot(q.reshape(S, c1), w2_ref[di * 3 + dj],
                            preferred_element_type=jnp.float32)
    acc2 = jnp.maximum(acc2 + b2_ref[...], 0.0)

    pooled = jnp.mean(acc2, axis=0, keepdims=True)           # (1, c2) global pool
    head = jnp.dot(pooled, wf_ref[...],
                   preferred_element_type=jnp.float32) + bf_ref[...]
    o_ref[...] = jnp.broadcast_to(head, o_ref.shape).astype(o_ref.dtype)


def encoder_forward(params, img, depth_img):
    """Synthetic VanillaRGGNet encoder: RGB + depth -> 6-DoF correction."""
    x = jnp.concatenate([img, depth_img], axis=1)            # (B, 4, H, W)
    x = x.transpose(0, 2, 3, 1).astype(jnp.float32)          # (B, H, W, 4)
    B, H, W, Cin = x.shape
    assert H % 4 == 0 and W % 4 == 0, "encoder assumes H, W divisible by 4"
    H2, W2 = H // 4, W // 4

    # 'same' halo for conv1, then stride-4 space-to-depth so every patch gather
    # inside the kernel is a static contiguous VMEM slice (no HBM im2col).
    xp = jnp.pad(x, ((0, 0), (1, 1), (1, 1), (0, 0)))
    Hp4, Wp4 = _round_up(H + 2, 4), _round_up(W + 2, 4)
    xp = jnp.pad(xp, ((0, 0), (0, Hp4 - (H + 2)), (0, Wp4 - (W + 2)), (0, 0)))
    Hq, Wq = Hp4 // 4, Wp4 // 4
    xph = xp.reshape(B, Hq, 4, Wq, 4, Cin).transpose(0, 2, 4, 1, 3, 5)
    xph = xph.reshape(B, 16 * Hq, Wq, Cin)

    w1, b1 = params["w1"], params["b1"]                      # (9, Cin, C1), (C1,)
    w2, b2 = params["w2"], params["b2"]                      # (9, C1, C2), (C2,)
    wf, bf = params["wf"], params["bf"]                      # (C2, 6), (6,)
    C1, C2, F = w1.shape[-1], w2.shape[-1], wf.shape[-1]
    Fpad = _round_up(F, _LANES)                              # lane-dense head out
    wf_p = jnp.pad(wf, ((0, 0), (0, Fpad - F))).astype(jnp.float32)
    bf_p = jnp.pad(bf.reshape(1, F), ((0, 0), (0, Fpad - F))).astype(jnp.float32)

    # Per-step VMEM: 2 x ~16*Hq x 8 x 128 x 4B input buffers + tiny weights;
    # well under the 32 MiB scoped limit on every generation incl. v7x.
    out = pl.pallas_call(
        functools.partial(_encoder_kernel, H2=H2, W2=W2, Hq=Hq,
                          cin=Cin, c1=C1, c2=C2),
        out_shape=jax.ShapeDtypeStruct((B, 8, Fpad), jnp.float32),
        grid=(B,),
        in_specs=[
            pl.BlockSpec((1, 16 * Hq, Wq, Cin), lambda b: (b, 0, 0, 0)),
            pl.BlockSpec((9, Cin, C1), lambda b: (0, 0, 0)),
            pl.BlockSpec((1, C1), lambda b: (0, 0)),
            pl.BlockSpec((9, C1, C2), lambda b: (0, 0, 0)),
            pl.BlockSpec((1, C2), lambda b: (0, 0)),
            pl.BlockSpec((C2, Fpad), lambda b: (0, 0)),
            pl.BlockSpec((1, Fpad), lambda b: (0, 0)),
        ],
        out_specs=pl.BlockSpec((1, 8, Fpad), lambda b: (b, 0, 0)),
        compiler_params=pltpu.CompilerParams(
            dimension_semantics=("parallel",),   # B>=2 -> both v7x cores busy
            vmem_limit_bytes=_VMEM_LIMIT),
    )(xph, w1.astype(jnp.float32), b1.reshape(1, C1).astype(jnp.float32),
      w2.astype(jnp.float32), b2.reshape(1, C2).astype(jnp.float32),
      wf_p, bf_p)
    # TODO(synk): for B == 1 on v7x, additionally split the spatial reduction
    # across the two TensorCores (second parallel grid axis + combine step).
    return out[:, 0, :F]                                     # (B, 6)


# ------------------- point-cloud transform + projection ---------------------

def _pcd_project_kernel(T_ref, cam_ref, pcd_ref, uvz_ref, *, n_valid):
    b = pl.program_id(0)
    fx, fy = cam_ref[0], cam_ref[1]
    cx, cy = cam_ref[2], cam_ref[3]

    x = pcd_ref[0, 0, :, :]                    # (R, 128): full (8,128) vregs
    y = pcd_ref[0, 1, :, :]
    z = pcd_ref[0, 2, :, :]

    def t(i, j):                               # scalar reads from SMEM
        return T_ref[b, 4 * i + j]

    xc = t(0, 0) * x + t(0, 1) * y + t(0, 2) * z + t(0, 3)
    yc = t(1, 0) * x + t(1, 1) * y + t(1, 2) * z + t(1, 3)
    zc = t(2, 0) * x + t(2, 1) * y + t(2, 2) * z + t(2, 3)

    rows = lax.broadcasted_iota(jnp.int32, x.shape, 0)
    lanes = lax.broadcasted_iota(jnp.int32, x.shape, 1)
    in_range = rows * _LANES + lanes < n_valid          # mask padded lanes
    valid = (zc > 1e-6) & in_range
    inv_z = 1.0 / jnp.where(valid, zc, 1.0)             # exact (pixel parity)

    uvz_ref[0, 0, :, :] = jnp.where(valid, fx * xc * inv_z + cx, -1.0)
    uvz_ref[0, 1, :, :] = jnp.where(valid, fy * yc * inv_z + cy, -1.0)
    uvz_ref[0, 2, :, :] = jnp.where(valid, zc, 0.0)


def pcd_transform_project(pcd, T, cam):
    """pcd: (B, 3, N), T: (B, 4, 4), cam: (4,) -> uvz (B, 3, Npad).

    Padded lanes are explicitly masked inside the kernel (z = 0, u = v = -1),
    so the downstream z-buffer always drops them.
    """
    B, _, N = pcd.shape
    Npad = _round_up(N, 8 * _LANES)            # full (8,128) sublane/lane tiles
    R = Npad // _LANES
    pcd_p = jnp.pad(pcd.astype(jnp.float32),
                    ((0, 0), (0, 0), (0, Npad - N))).reshape(B, 3, R, _LANES)
    T_flat = T.reshape(B, 16).astype(jnp.float32)
    uvz = pl.pallas_call(
        functools.partial(_pcd_project_kernel, n_valid=N),
        out_shape=jax.ShapeDtypeStruct((B, 3, R, _LANES), jnp.float32),
        grid=(B,),
        in_specs=[pl.BlockSpec(memory_space=pltpu.SMEM),        # T (B, 16)
                  pl.BlockSpec(memory_space=pltpu.SMEM),        # cam (4,)
                  pl.BlockSpec((1, 3, R, _LANES), lambda b: (b, 0, 0, 0))],
        out_specs=pl.BlockSpec((1, 3, R, _LANES), lambda b: (b, 0, 0, 0)),
        compiler_params=pltpu.CompilerParams(
            dimension_semantics=("parallel",),
            vmem_limit_bytes=_VMEM_LIMIT),
    )(T_flat, cam.astype(jnp.float32), pcd_p)
    return uvz.reshape(B, 3, Npad)


# ------------------------------- JAX glue -----------------------------------

def _hat(w):
    wx, wy, wz = w[..., 0], w[..., 1], w[..., 2]
    O = jnp.zeros_like(wx)
    return jnp.stack([jnp.stack([O, -wz, wy], axis=-1),
                      jnp.stack([wz, O, -wx], axis=-1),
                      jnp.stack([-wy, wx, O], axis=-1)], axis=-2)


def se3_exp(x):
    """x: (B, 6) = [v, w] -> (B, 4, 4)."""
    v, w = x[:, :3], x[:, 3:]
    theta = jnp.sqrt(jnp.sum(w * w, axis=-1))[:, None, None]
    small = theta < 1e-6
    th = jnp.where(small, 1.0, theta)
    t2 = theta * theta
    A = jnp.where(small, 1.0 - t2 / 6.0, jnp.sin(th) / th)
    Bc = jnp.where(small, 0.5 - t2 / 24.0, (1.0 - jnp.cos(th)) / (th * th))
    C = jnp.where(small, 1.0 / 6.0 - t2 / 120.0, (th - jnp.sin(th)) / (th ** 3))
    W = _hat(w)
    W2 = W @ W
    I = jnp.eye(3, dtype=x.dtype)[None]
    R = I + A * W + Bc * W2
    V = I + Bc * W + C * W2
    t = V @ v[..., None]
    top = jnp.concatenate([R, t], axis=-1)
    bottom = jnp.tile(jnp.array([[[0.0, 0.0, 0.0, 1.0]]], x.dtype),
                      (x.shape[0], 1, 1))
    return jnp.concatenate([top, bottom], axis=-2)


def se3_log(T):
    """T: (B, 4, 4) -> (B, 6) = [v, w]."""
    R = T[:, :3, :3]
    t = T[:, :3, 3]
    tr = R[:, 0, 0] + R[:, 1, 1] + R[:, 2, 2]
    cosang = jnp.clip((tr - 1.0) * 0.5, -1.0, 1.0)
    theta = jnp.arccos(cosang)[:, None, None]
    small = theta < 1e-6
    th = jnp.where(small, 1.0, theta)
    t2 = theta * theta
    fac = jnp.where(small, 0.5 + t2 / 12.0, th / (2.0 * jnp.sin(th)))
    W = fac * (R - jnp.swapaxes(R, -1, -2))
    w = jnp.stack([W[:, 2, 1], W[:, 0, 2], W[:, 1, 0]], axis=-1)
    W2 = W @ W
    A = jnp.where(small, 1.0 - t2 / 6.0, jnp.sin(th) / th)
    Bc = jnp.where(small, 0.5 - t2 / 24.0, (1.0 - jnp.cos(th)) / (th * th))
    coef = jnp.where(small, 1.0 / 12.0, (1.0 - A / (2.0 * Bc)) / (th * th))
    Vinv = jnp.eye(3, dtype=T.dtype)[None] - 0.5 * W + coef * W2
    v = (Vinv @ t[..., None])[..., 0]
    return jnp.concatenate([v, w], axis=-1)


def build_depth_image(uvz, H, W):
    # TODO(synk): the per-point z-buffer scatter has no clean Pallas TPU
    # equivalent; done with an XLA scatter-min here (glue, not the hot path).
    u = jnp.round(uvz[:, 0, :]).astype(jnp.int32)
    v = jnp.round(uvz[:, 1, :]).astype(jnp.int32)
    z = uvz[:, 2, :]

    def per_batch(u_b, v_b, z_b):
        valid = (z_b > 0.0) & (u_b >= 0) & (u_b < W) & (v_b >= 0) & (v_b < H)
        idx = jnp.where(valid, v_b * W + u_b, H * W)
        flat = jnp.full((H * W + 1,), jnp.inf, jnp.float32)
        flat = flat.at[idx].min(jnp.where(valid, z_b, jnp.inf))   # nearest point
        flat = jnp.where(jnp.isinf(flat), 0.0, flat)
        return flat[:H * W].reshape(1, H, W)

    return jax.vmap(per_batch)(u, v, z)              # (B, 1, H, W)


def rggnet_forward(params, img, pcd, Tcl, camera_info):
    cam = jnp.array([camera_info["fx"], camera_info["fy"],
                     camera_info["cx"], camera_info["cy"]], jnp.float32)
    uvz = pcd_transform_project(pcd, Tcl, cam)       # Pallas: transform+project
    depth_img = build_depth_image(uvz, camera_info["H"], camera_info["W"])
    return encoder_forward(params, img, depth_img)   # Pallas: fused encoder


def rgg_denoiser_forward(params, x_t, x_cond):
    img, pcd, Tcl, camera_info = x_cond
    se3_x_t = se3_exp(x_t)                           # (B, 4, 4)
    # TODO(synk): tiny batched 4x4 SE(3) composes stay in plain XLA.
    Tcl_new = se3_x_t @ Tcl
    delta_x0 = rggnet_forward(params, img, pcd, Tcl_new, camera_info)
    x0 = se3_exp(delta_x0) @ se3_x_t
    return se3_log(x0)                               # (B, 6)


def init_params(key):
    k1, k2, k3 = jax.random.split(key, 3)
    c_in, c1, c2 = 4, 16, 32
    return {
        "w1": 0.1 * jax.random.normal(k1, (9, c_in, c1), jnp.float32),
        "b1": jnp.zeros((c1,), jnp.float32),
        "w2": 0.1 * jax.random.normal(k2, (9, c1, c2), jnp.float32),
        "b2": jnp.zeros((c2,), jnp.float32),
        "wf": 0.01 * jax.random.normal(k3, (c2, 6), jnp.float32),
        "bf": jnp.zeros((6,), jnp.float32),
    }


if __name__ == "__main__":
    key = jax.random.PRNGKey(0)
    k_img, k_xy, k_z, k_T, k_x, k_p = jax.random.split(key, 6)

    B, H, W, N = 2, 16, 16, 256
    img = jax.random.uniform(k_img, (B, 3, H, W), jnp.float32)
    xy = jax.random.uniform(k_xy, (B, 2, N), jnp.float32, minval=-1.0, maxval=1.0)
    z = jax.random.uniform(k_z, (B, 1, N), jnp.float32, minval=1.0, maxval=4.0)
    pcd = jnp.concatenate([xy * z, z], axis=1)          # (B, 3, N) in front of cam
    Tcl = se3_exp(0.05 * jax.random.normal(k_T, (B, 6), jnp.float32))
    x_t = 0.1 * jax.random.normal(k_x, (B, 6), jnp.float32)
    camera_info = {"fx": 16.0, "fy": 16.0, "cx": 8.0, "cy": 8.0, "H": H, "W": W}
    params = init_params(k_p)

    out = rgg_denoiser_forward(params, x_t, (img, pcd, Tcl, camera_info))
    jax.block_until_ready(out)
    assert out.shape == (B, 6)
    print("KERNEL_OK")
</pallas_src>

<mosaic_0001>
module attributes {stable_mosaic.version = 11 : i64} {
  func.func @_pcd_project_kernel(%arg0: i32, %arg1: memref<2x16xf32, #tpu.memory_space<smem>>, %arg2: memref<4xf32, #tpu.memory_space<smem>>, %arg3: memref<1x3x8x128xf32, #tpu.memory_space<vmem>>, %arg4: memref<1x3x8x128xf32, #tpu.memory_space<vmem>>) attributes {dimension_semantics = [#tpu.dimension_semantics<parallel>], iteration_bounds = array<i64: 2>, scalar_prefetch = 0 : i64, scratch_operands = 0 : i64, tpu.core_type = #tpu.core_type<tc>, window_params = [{transform_indices = @transform_0, window_bounds = array<i64: 2, 16>}, {transform_indices = @transform_1, window_bounds = array<i64: 4>}, {transform_indices = @transform_2, window_bounds = array<i64: 1, 3, 8, 128>}, {transform_indices = @transform_3, window_bounds = array<i64: 1, 3, 8, 128>}]} {
    %c0 = arith.constant 0 : index
    %0 = memref.load %arg2[%c0] : memref<4xf32, #tpu.memory_space<smem>>
    %c1 = arith.constant 1 : index
    %1 = memref.load %arg2[%c1] : memref<4xf32, #tpu.memory_space<smem>>
    %c2 = arith.constant 2 : index
    %2 = memref.load %arg2[%c2] : memref<4xf32, #tpu.memory_space<smem>>
    %c3 = arith.constant 3 : index
    %3 = memref.load %arg2[%c3] : memref<4xf32, #tpu.memory_space<smem>>
    %c0_0 = arith.constant 0 : index
    %c0_1 = arith.constant 0 : index
    %c0_2 = arith.constant 0 : index
    %c0_3 = arith.constant 0 : index
    %4 = vector.load %arg3[%c0_0, %c0_1, %c0_2, %c0_3] : memref<1x3x8x128xf32, #tpu.memory_space<vmem>>, vector<1x1x8x128xf32>
    %5 = vector.shape_cast %4 : vector<1x1x8x128xf32> to vector<8x128xf32>
    %c0_4 = arith.constant 0 : index
    %c1_5 = arith.constant 1 : index
    %c0_6 = arith.constant 0 : index
    %c0_7 = arith.constant 0 : index
    %6 = vector.load %arg3[%c0_4, %c1_5, %c0_6, %c0_7] : memref<1x3x8x128xf32, #tpu.memory_space<vmem>>, vector<1x1x8x128xf32>
    %7 = vector.shape_cast %6 : vector<1x1x8x128xf32> to vector<8x128xf32>
    %c0_8 = arith.constant 0 : index
    %c2_9 = arith.constant 2 : index
    %c0_10 = arith.constant 0 : index
    %c0_11 = arith.constant 0 : index
    %8 = vector.load %arg3[%c0_8, %c2_9, %c0_10, %c0_11] : memref<1x3x8x128xf32, #tpu.memory_space<vmem>>, vector<1x1x8x128xf32>
    %9 = vector.shape_cast %8 : vector<1x1x8x128xf32> to vector<8x128xf32>
    %10 = arith.index_cast %arg0 : i32 to index
    %c0_12 = arith.constant 0 : index
    %11 = memref.load %arg1[%10, %c0_12] : memref<2x16xf32, #tpu.memory_space<smem>>
    %12 = vector.broadcast %11 : f32 to vector<8x128xf32>
    %13 = arith.mulf %12, %5 : vector<8x128xf32>
    %14 = arith.index_cast %arg0 : i32 to index
    %c1_13 = arith.constant 1 : index
    %15 = memref.load %arg1[%14, %c1_13] : memref<2x16xf32, #tpu.memory_space<smem>>
    %16 = vector.broadcast %15 : f32 to vector<8x128xf32>
    %17 = arith.mulf %16, %7 : vector<8x128xf32>
    %18 = arith.addf %13, %17 : vector<8x128xf32>
    %19 = arith.index_cast %arg0 : i32 to index
    %c2_14 = arith.constant 2 : index
    %20 = memref.load %arg1[%19, %c2_14] : memref<2x16xf32, #tpu.memory_space<smem>>
    %21 = vector.broadcast %20 : f32 to vector<8x128xf32>
    %22 = arith.mulf %21, %9 : vector<8x128xf32>
    %23 = arith.addf %18, %22 : vector<8x128xf32>
    %24 = arith.index_cast %arg0 : i32 to index
    %c3_15 = arith.constant 3 : index
    %25 = memref.load %arg1[%24, %c3_15] : memref<2x16xf32, #tpu.memory_space<smem>>
    %26 = vector.broadcast %25 : f32 to vector<8x128xf32>
    %27 = arith.addf %23, %26 : vector<8x128xf32>
    %28 = arith.index_cast %arg0 : i32 to index
    %c4 = arith.constant 4 : index
    %29 = memref.load %arg1[%28, %c4] : memref<2x16xf32, #tpu.memory_space<smem>>
    %30 = vector.broadcast %29 : f32 to vector<8x128xf32>
    %31 = arith.mulf %30, %5 : vector<8x128xf32>
    %32 = arith.index_cast %arg0 : i32 to index
    %c5 = arith.constant 5 : index
    %33 = memref.load %arg1[%32, %c5] : memref<2x16xf32, #tpu.memory_space<smem>>
    %34 = vector.broadcast %33 : f32 to vector<8x128xf32>
    %35 = arith.mulf %34, %7 : vector<8x128xf32>
    %36 = arith.addf %31, %35 : vector<8x128xf32>
    %37 = arith.index_cast %arg0 : i32 to index
    %c6 = arith.constant 6 : index
    %38 = memref.load %arg1[%37, %c6] : memref<2x16xf32, #tpu.memory_space<smem>>
    %39 = vector.broadcast %38 : f32 to vector<8x128xf32>
    %40 = arith.mulf %39, %9 : vector<8x128xf32>
    %41 = arith.addf %36, %40 : vector<8x128xf32>
    %42 = arith.index_cast %arg0 : i32 to index
    %c7 = arith.constant 7 : index
    %43 = memref.load %arg1[%42, %c7] : memref<2x16xf32, #tpu.memory_space<smem>>
    %44 = vector.broadcast %43 : f32 to vector<8x128xf32>
    %45 = arith.addf %41, %44 : vector<8x128xf32>
    %46 = arith.index_cast %arg0 : i32 to index
    %c8 = arith.constant 8 : index
    %47 = memref.load %arg1[%46, %c8] : memref<2x16xf32, #tpu.memory_space<smem>>
    %48 = vector.broadcast %47 : f32 to vector<8x128xf32>
    %49 = arith.mulf %48, %5 : vector<8x128xf32>
    %50 = arith.index_cast %arg0 : i32 to index
    %c9 = arith.constant 9 : index
    %51 = memref.load %arg1[%50, %c9] : memref<2x16xf32, #tpu.memory_space<smem>>
    %52 = vector.broadcast %51 : f32 to vector<8x128xf32>
    %53 = arith.mulf %52, %7 : vector<8x128xf32>
    %54 = arith.addf %49, %53 : vector<8x128xf32>
    %55 = arith.index_cast %arg0 : i32 to index
    %c10 = arith.constant 10 : index
    %56 = memref.load %arg1[%55, %c10] : memref<2x16xf32, #tpu.memory_space<smem>>
    %57 = vector.broadcast %56 : f32 to vector<8x128xf32>
    %58 = arith.mulf %57, %9 : vector<8x128xf32>
    %59 = arith.addf %54, %58 : vector<8x128xf32>
    %60 = arith.index_cast %arg0 : i32 to index
    %c11 = arith.constant 11 : index
    %61 = memref.load %arg1[%60, %c11] : memref<2x16xf32, #tpu.memory_space<smem>>
    %62 = vector.broadcast %61 : f32 to vector<8x128xf32>
    %63 = arith.addf %59, %62 : vector<8x128xf32>
    %64 = tpu.iota {dimensions = array<i32: 0>} : vector<8x128xi32>
    %65 = tpu.iota {dimensions = array<i32: 1>} : vector<8x128xi32>
    %c128_i32 = arith.constant 128 : i32
    %66 = vector.broadcast %c128_i32 : i32 to vector<8x128xi32>
    %67 = arith.muli %64, %66 : vector<8x128xi32>
    %68 = arith.addi %67, %65 : vector<8x128xi32>
    %c256_i32 = arith.constant 256 : i32
    %69 = vector.broadcast %c256_i32 : i32 to vector<8x128xi32>
    %70 = arith.cmpi slt, %68, %69 : vector<8x128xi32>
    %cst = arith.constant 9.99999997E-7 : f32
    %71 = vector.broadcast %cst : f32 to vector<8x128xf32>
    %72 = arith.cmpf ogt, %63, %71 : vector<8x128xf32>
    %73 = arith.andi %72, %70 : vector<8x128xi1>
    %cst_16 = arith.constant 1.000000e+00 : f32
    %74 = vector.broadcast %cst_16 : f32 to vector<8x128xf32>
    %75 = arith.select %73, %63, %74 : vector<8x128xi1>, vector<8x128xf32>
    %cst_17 = arith.constant 1.000000e+00 : f32
    %76 = vector.broadcast %cst_17 : f32 to vector<8x128xf32>
    %77 = arith.divf %76, %75 : vector<8x128xf32>
    %78 = vector.broadcast %0 : f32 to vector<8x128xf32>
    %79 = arith.mulf %78, %27 : vector<8x128xf32>
    %80 = arith.mulf %79, %77 : vector<8x128xf32>
    %81 = vector.broadcast %2 : f32 to vector<8x128xf32>
    %82 = arith.addf %80, %81 : vector<8x128xf32>
    %cst_18 = arith.constant -1.000000e+00 : f32
    %83 = vector.broadcast %cst_18 : f32 to vector<8x128xf32>
    %84 = arith.select %73, %82, %83 : vector<8x128xi1>, vector<8x128xf32>
    %c0_19 = arith.constant 0 : index
    %c0_20 = arith.constant 0 : index
    %c0_21 = arith.constant 0 : index
    %c0_22 = arith.constant 0 : index
    %85 = vector.load %arg4[%c0_19, %c0_20, %c0_21, %c0_22] : memref<1x3x8x128xf32, #tpu.memory_space<vmem>>, vector<1x1x8x128xf32>
    %86 = vector.shape_cast %85 : vector<1x1x8x128xf32> to vector<8x128xf32>
    %87 = vector.shape_cast %84 : vector<8x128xf32> to vector<1x1x8x128xf32>
    tpu.vector_store %arg4[%c0_19, %c0_20, %c0_21, %c0_22], %87 {strides = array<i32>} : memref<1x3x8x128xf32, #tpu.memory_space<vmem>>, vector<1x1x8x128xf32>,
    %88 = vector.broadcast %1 : f32 to vector<8x128xf32>
    %89 = arith.mulf %88, %45 : vector<8x128xf32>
    %90 = arith.mulf %89, %77 : vector<8x128xf32>
    %91 = vector.broadcast %3 : f32 to vector<8x128xf32>
    %92 = arith.addf %90, %91 : vector<8x128xf32>
    %cst_23 = arith.constant -1.000000e+00 : f32
    %93 = vector.broadcast %cst_23 : f32 to vector<8x128xf32>
    %94 = arith.select %73, %92, %93 : vector<8x128xi1>, vector<8x128xf32>
    %c0_24 = arith.constant 0 : index
    %c1_25 = arith.constant 1 : index
    %c0_26 = arith.constant 0 : index
    %c0_27 = arith.constant 0 : index
    %95 = vector.load %arg4[%c0_24, %c1_25, %c0_26, %c0_27] : memref<1x3x8x128xf32, #tpu.memory_space<vmem>>, vector<1x1x8x128xf32>
    %96 = vector.shape_cast %95 : vector<1x1x8x128xf32> to vector<8x128xf32>
    %97 = vector.shape_cast %94 : vector<8x128xf32> to vector<1x1x8x128xf32>
    tpu.vector_store %arg4[%c0_24, %c1_25, %c0_26, %c0_27], %97 {strides = array<i32>} : memref<1x3x8x128xf32, #tpu.memory_space<vmem>>, vector<1x1x8x128xf32>,
    %cst_28 = arith.constant 0.000000e+00 : f32
    %98 = vector.broadcast %cst_28 : f32 to vector<8x128xf32>
    %99 = arith.select %73, %63, %98 : vector<8x128xi1>, vector<8x128xf32>
    %c0_29 = arith.constant 0 : index
    %c2_30 = arith.constant 2 : index
    %c0_31 = arith.constant 0 : index
    %c0_32 = arith.constant 0 : index
    %100 = vector.load %arg4[%c0_29, %c2_30, %c0_31, %c0_32] : memref<1x3x8x128xf32, #tpu.memory_space<vmem>>, vector<1x1x8x128xf32>
    %101 = vector.shape_cast %100 : vector<1x1x8x128xf32> to vector<8x128xf32>
    %102 = vector.shape_cast %99 : vector<8x128xf32> to vector<1x1x8x128xf32>
    tpu.vector_store %arg4[%c0_29, %c2_30, %c0_31, %c0_32], %102 {strides = array<i32>} : memref<1x3x8x128xf32, #tpu.memory_space<vmem>>, vector<1x1x8x128xf32>,
    return
  }
  func.func @transform_0(%arg0: i32) -> (i32, i32) {
    %c0_i32 = arith.constant 0 : i32
    %c0_i32_0 = arith.constant 0 : i32
    %c0_i32_1 = arith.constant 0 : i32
    return %c0_i32, %c0_i32_0 : i32, i32
  }
  func.func @transform_1(%arg0: i32) -> i32 {
    %c0_i32 = arith.constant 0 : i32
    %c0_i32_0 = arith.constant 0 : i32
    return %c0_i32 : i32
  }
  func.func @transform_2(%arg0: i32) -> (i32, i32, i32, i32) {
    %c0_i32 = arith.constant 0 : i32
    %c0_i32_0 = arith.constant 0 : i32
    %c0_i32_1 = arith.constant 0 : i32
    %c0_i32_2 = arith.constant 0 : i32
    return %arg0, %c0_i32, %c0_i32_0, %c0_i32_1 : i32, i32, i32, i32
  }
  func.func @transform_3(%arg0: i32) -> (i32, i32, i32, i32) {
    %c0_i32 = arith.constant 0 : i32
    %c0_i32_0 = arith.constant 0 : i32
    %c0_i32_1 = arith.constant 0 : i32
    %c0_i32_2 = arith.constant 0 : i32
    return %arg0, %c0_i32, %c0_i32_0, %c0_i32_1 : i32, i32, i32, i32
  }
}

</mosaic_0001>

<bundles_post_ra>
// kernel: tpu_custom_call.1
= control target key start
LH: loop header
LB: loop body
LE: loop exit
PB: predicated region body
PF: predicated region fallthrough
CT: control target
= control target key end

     0   :  { %8 = vsyncpa [#allocation5], 0  ;;  %s905_s0 = inlined_call_operand.hbm [shape: f32[2,16], index: 0, kind: input, shape index: {}]   ;;  %s906_s1 = inlined_call_operand.vmem [shape: f32[4], index: 1, kind: input, shape index: {}]   ;;  %s907_s2 = inlined_call_operand.hbm [shape: f32[2,3,8,128], index: 2, kind: input, shape index: {}]   ;;  %s908_s3 = inlined_call_operand.hbm [shape: f32[2,3,8,128], index: 3, kind: output, shape index: {}]  }
   0x1   :  { %9 = vsyncpa [#allocation6], 0 }
   0x2   :  { %10 = vsyncpa [#allocation3], 0 }
   0x3   :  { %12 = vsyncpa [#allocation3 + $0x1], 0 }
   0x4   :  { %13 = vsyncpa [#allocation4], 0 }
   0x5   :  { %15 = vsyncpa [#allocation4 + $0x1], 0  ;;  %s671_s12 = smov 0   ;;  %s673_s13 = smov 0  }
   0x6   :  { %s675_s14 = smov 0   ;;  %s677_s15 = smov 0  }
   0x7 LB: > { %s692_s16 = sadd.s32 4294967295, %s641_s15   ;;  %s418_s17 = sadd.s32 4294967294, %s641_s15   ;;  %s641_s15 = sphi %s677_s15, %s935_s15   ;;  %s637_s14 = sphi %s675_s14, %s934_s14   ;;  %s633_s13 = sphi %s673_s13, %s933_s13   ;;  %s629_s12 = sphi %s671_s12, %s932_s12  }
   0x8   : > { %s696_s18 = sadd.s32 1, %s641_s15   ;;  %s70_s19 = sadd.s32 1, %s637_s14 }
   0x9   : > { %s67_s20 = ssub.s32 %s641_s15, %s696_s18  ;;  %p77_p0 = scmp.ne.s32.totalorder %s637_s14, %s633_s13 }
   0xa   : > { %p68_p1 = scmp.eq.s32.totalorder %s67_s20, 0  ;;  %p78_p2 = scmp.eq.s32.totalorder %s641_s15, 0 }
   0xb   : > { %p83_p3 = scmp.ne.s32.totalorder %s633_s13, %s629_s12  ;;  %p909_p4 = scmp.eq.s32.totalorder %s692_s16, 0 }
   0xc   : > { %s708_s21 = scalar_select %p68_p1, %s637_s14, %s70_s19  }
   0xd   : > { %p710_p5 = por %p78_p2, %p77_p0  ;;  %p716_p6 = por %p909_p4, %p83_p3 }
   0xe   : > { %p107_p7 = scmp.eq.s32.totalorder %s692_s16, 1  ;;  %p113_p8 = scmp.eq.s32.totalorder %s418_s17, 1 }
   0xf   : > { %s914_s23 = scalar_select %p716_p6, 1, 0 }
  0x10   : > { %p419_p9 = scmp.ge.s32.totalorder %s641_s15, 1  ;;  %p120_p10 = scmp.lt.s32.totalorder %s641_s15, 3 }
  0x11   : > { %p723_p11 = por %p107_p7, %p77_p0  ;;  %p727_p12 = por %p113_p8, %p83_p3 }
  0x12   : > { %p731_p13 = pnand %p419_p9, %p120_p10  ;;  %p471_p4 = scmp.lt.s32.totalorder %s641_s15, 2 }
  0x13   : > { %s915_s24 = scalar_select %p723_p11, 1, 0 }
  0x14   : > { %s916_s25 = scalar_select %p727_p12, 1, 0 }
  0x15   : > { %s917_s26 = scalar_select %p731_p13, 1, 0 }
  0x16   : > { %p454_p2 = pneg %p731_p13  ;;  %s142_s29 = sshll.u32 %s906_s1, 4  ;;  %s143_s29 = int_to_ptr.vmem [resolvable:$true] %s142_s29 }
  0x17   : > { %p918_p0 = scmp.eq.s32.totalorder %s692_s16, 0  ;;  %p750_p3 = pnand %p471_p4, %p710_p5 }
  0x18   : > { %s153_s5 = sand.u32 1, %s637_s14   ;;  %s643_s6 = smov [#allocation2]  }
  0x19   : > { %p744_p7 = pnand %p454_p2, %p918_p0  ;;  %s526_s9 = scalar_lea.vmem %s143_s29, 16 }
  0x1a   : > { %p527_p8 = scmp.ne.s32.totalorder %s143_s29, %s526_s9  ;;  %p534_p0 = scmp.lt.s32.totalorder %s143_s29, %s143_s29 }
  0x1b   : > { %457 = dma.hbm_to_smem (!%p744_p7), %s905_s0, 32, %s643_s6, [#allocation5]  }
  0x1c   : > { %p528_p9 = pneg %p744_p7  ;;  %p535_p1 = scmp.lt.s32.totalorder %s526_s9, %s526_s9 }
  0x1e   : > { %p529_p10 = pnand %p528_p9, %p527_p8  ;;  %p536_p4 = por %p535_p1, %p534_p0 }
  0x20   : > { %p530_p2 = pneg %p529_p10 }
  0x22   : > { %p537_p5 = pnand %p536_p4, %p530_p2 }
  0x24   : > { %540 = shalt.err (!%p537_p5)
}
  0x25   : > { %s644_s10 = smov [#allocation7]   ;;  %s438_s11 = smul.u32 24, %s153_s5 }
  0x26   : > { %460 = dma.vmem_to_smem (!%p744_p7), %s143_s29, 16, %s644_s10, [#allocation6]  }
  0x27   : > { %s439_s17 = smul.u32 384, %s641_s15  ;;  %s157_s27 = scalar_lea.vmem [#allocation8], %s438_s11 }
  0x28   : > { %s164_s28 = sshll.u32 %s157_s27, 4  ;;  %s772_s6 = scalar_lea.sflag [#allocation3], %s153_s5  ;;  %s770_s28 = int_to_ptr.vmem [resolvable:$true] %s164_s28 }
  0x29   : > { %s768_s22 = scalar_lea.hbm %s907_s2, %s439_s17  ;;  %p543_p7 = pneg %p750_p3 }
  0x2a   : > { %s541_s30 = scalar_lea.hbm %s768_s22, 384  ;;  %s546_s8 = scalar_lea.hbm %s907_s2, 768 }
  0x2b   : > { %p542_p1 = scmp.ne.s32.totalorder %s768_s22, %s541_s30  ;;  %p547_p10 = scmp.lt.s32.totalorder %s768_s22, %s907_s2 }
  0x2c   : > { %p548_p2 = scmp.lt.s32.totalorder %s546_s8, %s541_s30 }
  0x2d   : > { %p544_p8 = pnand %p543_p7, %p542_p1 }
  0x2e   : > { %p549_p0 = por %p548_p2, %p547_p10 }
  0x2f   : > { %p545_p9 = pneg %p544_p8 }
  0x31   : > { %p550_p4 = pnand %p549_p0, %p545_p9 }
  0x33   : > { %553 = shalt.err (!%p550_p4)
}
  0x34   : > { %s554_s5 = scalar_lea.vmem %s770_s28, 384  ;;  %s645_s11 = smov [#allocation8]  }
  0x35   : > { %p555_p5 = scmp.ne.s32.totalorder %s770_s28, %s554_s5  ;;  %s559_s17 = sshll.u32 %s645_s11, 4  ;;  %s560_s17 = int_to_ptr.vmem [resolvable:$false] %s559_s17 }
  0x36   : > { %s561_s19 = scalar_lea.vmem %s560_s17, 768  ;;  %p562_p8 = scmp.lt.s32.totalorder %s770_s28, %s560_s17 }
  0x37   : > { %p557_p12 = pnand %p555_p5, %p543_p7  ;;  %p563_p11 = scmp.lt.s32.totalorder %s561_s19, %s554_s5 }
  0x39   : > { %p558_p1 = pneg %p557_p12  ;;  %p564_p6 = por %p563_p11, %p562_p8 }
  0x3b   : > { %p565_p13 = pnand %p564_p6, %p558_p1 }
  0x3d   : > { %568 = shalt.err (!%p565_p13)
}
  0x3e   : > { %s646_s20 = smov 128   ;;  %s647_s27 = smov 8  }
  0x3f   : > { %464 = dma.hbm_to_vmem [thread:$0]  (!%p750_p3), %s768_s22, 384, %s770_s28, %s772_s6, %s646_s20, %s646_s20, %s647_s27  }
  0x40   : > { %p921_p7 = scmp.ne.s32.totalorder %s917_s26, 0 }
  0x41   : > { %p922_p12 = scmp.eq.s32.totalorder (!%p921_p7), %s692_s16, 0 }
  0x42   : > { %176 = sbr.rel (%p921_p7) target bundleno = 139 (0x8b), region = 32 }
  0x47   : > { %612 = dma.done.wait (%p922_p12), [#allocation5], 32   ;;  %p923_p9 = pmov %p922_p12 }
  0x49   : > { %614 = vsyncadd (%p923_p9), [#allocation5], 4294967264  ;;  %p924_p6 = pmov %p923_p9 }
  0x4b   : > { %616 = dma.done.wait (%p924_p6), [#allocation6], 16   ;;  %p925_p11 = pmov %p924_p6 }
  0x4c   : > { %s804_s30 = sand.u32 1, %s633_s13   ;;  %p926_p13 = scmp.ne.s32.totalorder %s914_s23, 0 }
  0x4d   : > { %618 = vsyncadd (%p925_p11), [#allocation6], 4294967280  ;;  %s440_s26 = smul.u32 24, %s804_s30  ;;  %s187_s4 = scalar_lea.sflag [#allocation3], %s804_s30 }
  0x4f   : > { %s190_s22 = scalar_lea.vmem [#allocation8], %s440_s26 }
  0x50   : > { %620 = dma.done.wait (%p926_p13), %s187_s4, 384  }
  0x51   : > { %622 = vsyncadd (%p926_p13), %s187_s4, 4294966912 }
  0x52   : > { %195 = sfence }
  0x53   : > { %s815_s28 = sshll.u32 %s692_s16, 7  ;;  %v277_v0 = vlaneseq  ;;  %v218_v2 = vld [vmem:[%s190_s22] sm:$0xff]  ;;  %v430_v5 = vld [vmem:[%s190_s22 + $0x8] sm:$0xff]  ;;  %v431_v6 = vld [vmem:[%s190_s22 + $0x10] sm:$0xff]  ;;  %p929_p10 = scmp.ne.s32.totalorder %s915_s24, 0 }
  0x54   : > { %s227_s6 = sadd.s32 1, %s815_s28  ;;  %s819_s29 = sld [smem:[#allocation2 + %s815_s28]] }
  0x55   : > { %s821_s7 = sld [smem:[#allocation2 + %s227_s6]]  ;;  %s232_s23 = sadd.s32 2, %s815_s28  ;;  %v278_v1 = vshrl.u32 %v277_v0, 7  ;;  %v280_v3 = vand.u32 127, %v277_v0 }
  0x56   : > { %s259_s8 = sadd.s32 8, %s815_s28  ;;  %s263_s10 = sadd.s32 9, %s815_s28 }
  0x57   : > { %s260_s9 = sld [smem:[#allocation2 + %s259_s8]]  ;;  %s268_s11 = sadd.s32 10, %s815_s28  ;;  %v281_v4 = vmul.u32 128, %v278_v1 }
  0x58   : > { %s264_s5 = sld [smem:[#allocation2 + %s263_s10]]  ;;  %s273_s19 = sadd.s32 11, %s815_s28 }
  0x59   : > { %s269_s17 = sld [smem:[#allocation2 + %s268_s11]]  ;;  %s241_s4 = sadd.s32 4, %s815_s28  ;;  %v282_v12 = vadd.s32 %v281_v4, %v280_v3 }
  0x5a   : > { %s828_s20 = sld [smem:[#allocation2 + %s273_s19]]  ;;  %s245_s8 = sadd.s32 5, %s815_s28  ;;  %v225_v14 = vstv %s819_s29 }
  0x5b   : > { %s830_s27 = sld [smem:[#allocation2 + %s232_s23]]  ;;  %s250_s11 = sadd.s32 6, %s815_s28  ;;  %v229_v15 = vstv %s821_s7  ;;  %vm283_vm0 = vcmp.lt.s32.totalorder %v282_v12, 256  ;;  %v226_v20 = vmul.f32 %v225_v14, %v218_v2 }
  0x5c   : > { %s242_s6 = sld [smem:[#allocation2 + %s241_s4]]  ;;  %s237_s23 = sadd.s32 3, %s815_s28  ;;  %v230_v21 = vmul.f32 %v430_v5, %v229_v15 }
  0x5d   : > { %v261_v7 = vstv %s260_s9  ;;  %s246_s10 = sld [smem:[#allocation2 + %s245_s8]]  ;;  %s255_s22 = sadd.s32 7, %s815_s28 }
  0x5e   : > { %v262_v8 = vmul.f32 %v261_v7, %v218_v2  ;;  %v265_v9 = vstv %s264_s5  ;;  %s251_s19 = sld [smem:[#allocation2 + %s250_s11]]  ;;  %v231_v28 = vadd.f32 %v230_v21, %v226_v20  ;;  %s213_s7 = scalar_lea.vmem [#allocation9], %s440_s26 }
  0x5f   : > { %v266_v10 = vmul.f32 %v430_v5, %v265_v9  ;;  %v270_v11 = vstv %s269_s17  ;;  %s238_s9 = sld [smem:[#allocation2 + %s237_s23]]  ;;  %s441_s26 = smul.u32 384, %s692_s16 }
  0x60   : > { %v271_v13 = vmul.f32 %v431_v6, %v270_v11  ;;  %v275_v17 = vstv %s828_s20  ;;  %s256_s5 = sld [smem:[#allocation2 + %s255_s22]]  ;;  %s308_s16 = scalar_lea.sflag [#allocation4], %s804_s30 }
  0x61   : > { %v267_v16 = vadd.f32 %v266_v10, %v262_v8  ;;  %v234_v24 = vstv %s830_s27  ;;  %s214_s29 = sld [smem:[#allocation7]]  ;;  %s321_s27 = sshll.u32 %s213_s7, 4  ;;  %s853_s27 = int_to_ptr.vmem [resolvable:$true] %s321_s27 }
  0x62   : > { %v243_v19 = vstv %s242_s6  ;;  %v235_v29 = vmul.f32 %v431_v6, %v234_v24  ;;  %s427_s28 = sld [smem:[#allocation7 + $0x1]]  ;;  %s858_s8 = scalar_lea.hbm %s908_s3, %s441_s26 }
  0x63   : > { %v272_v18 = vadd.f32 %v271_v13, %v267_v16  ;;  %v244_v22 = vmul.f32 %v243_v19, %v218_v2  ;;  %v247_v23 = vstv %s246_s10  ;;  %s428_s17 = sld [smem:[#allocation7 + $0x2]]  ;;  %s569_s10 = scalar_lea.vmem %s853_s27, 384 }
  0x64   : > { %v248_v26 = vmul.f32 %v430_v5, %v247_v23  ;;  %v252_v27 = vstv %s251_s19  ;;  %v236_v35 = vadd.f32 %v235_v29, %v231_v28  ;;  %s429_s20 = sld [smem:[#allocation7 + $0x3]]  ;;  %p570_p3 = scmp.ne.s32.totalorder %s853_s27, %s569_s10 }
  0x65   : > { %v276_v25 = vadd.f32 %v275_v17, %v272_v18  ;;  %v253_v32 = vmul.f32 %v431_v6, %v252_v27  ;;  %v239_v37 = vstv %s238_s9  ;;  %s648_s11 = smov [#allocation9]  }
  0x66   : > { %v249_v31 = vadd.f32 %v248_v26, %v244_v22  ;;  %v257_v38 = vstv %s256_s5  ;;  %v240_v39 = vadd.f32 %v239_v37, %v236_v35  ;;  %p571_p2 = pnand %p570_p3, %p929_p10  ;;  %s573_s19 = sshll.u32 %s648_s11, 4  ;;  %s574_s19 = int_to_ptr.vmem [resolvable:$false] %s573_s19 }
  0x67   : > { %vm284_vm1 = vcmp.gt.f32.partialorder %v276_v25, 1e-06  ;;  %v289_v41 = vstv %s214_s29  ;;  %s575_s23 = scalar_lea.vmem %s574_s19, 768  ;;  %p576_p4 = scmp.lt.s32.totalorder %s853_s27, %s574_s19 }
  0x68   : > { %vm842_vm2 = vmand %vm284_vm1, %vm283_vm0  ;;  %v254_v36 = vadd.f32 %v253_v32, %v249_v31  ;;  %v296_v42 = vstv %s427_s28  ;;  %v290_v43 = vmul.f32 %v289_v41, %v240_v39  ;;  %p572_p0 = pneg %p571_p2  ;;  %p577_p5 = scmp.lt.s32.totalorder %s575_s23, %s569_s10 }
  0x69   : > { %v286_v33 = vsel %vm842_vm2, %v276_v25, 1.0  ;;  %v304_v34 = vsel %vm842_vm2, %v276_v25, 0.0  ;;  %v292_v46 = vstv %s428_s17 }
  0x6a   : > { %513 = vrcp.f32 %v286_v33  ;;  %434 = vst [vmem:[%s213_s7 + $0x10] sm:$0xff] %v304_v34  ;;  %v258_v40 = vadd.f32 %v257_v38, %v254_v36  ;;  %v299_v47 = vstv %s429_s20  ;;  %p578_p1 = por %p577_p5, %p576_p4 }
  0x6c   : > { %v297_v44 = vmul.f32 %v296_v42, %v258_v40  ;;  %p579_p8 = pnand %p578_p1, %p572_p0 }
  0x77   : > { %v514_v45 = vpop.eup %513 }
  0x78   : > { %v291_v48 = vmul.f32 %v514_v45, %v290_v43  ;;  %v298_v49 = vmul.f32 %v514_v45, %v297_v44 }
  0x7a   : > { %v293_v50 = vadd.f32 %v292_v46, %v291_v48  ;;  %v300_v51 = vadd.f32 %v299_v47, %v298_v49 }
  0x7c   : > { %v294_v52 = vsel %vm842_vm2, %v293_v50, -1.0  ;;  %v301_v53 = vsel %vm842_vm2, %v300_v51, -1.0 }
  0x7d   : > { %295 = vst [vmem:[%s213_s7] sm:$0xff] %v294_v52  ;;  %433 = vst [vmem:[%s213_s7 + $0x8] sm:$0xff] %v301_v53 }
  0x7e   : > { %582 = shalt.err (!%p579_p8)
}
  0x7f   : > { %s583_s22 = scalar_lea.hbm %s858_s8, 384  ;;  %s587_s29 = scalar_lea.hbm %s908_s3, 768 }
  0x80   : > { %p584_p7 = scmp.ne.s32.totalorder %s858_s8, %s583_s22  ;;  %p588_p6 = scmp.lt.s32.totalorder %s858_s8, %s908_s3 }
  0x81   : > { %p589_p11 = scmp.lt.s32.totalorder %s587_s29, %s583_s22 }
  0x82   : > { %p585_p12 = pnand %p584_p7, %p929_p10 }
  0x83   : > { %p590_p13 = por %p589_p11, %p588_p6 }
  0x84   : > { %p586_p9 = pneg %p585_p12 }
  0x86   : > { %p591_p3 = pnand %p590_p13, %p586_p9 }
  0x88   : > { %594 = shalt.err (!%p591_p3)
}
  0x89   : > { %s649_s17 = smov 128   ;;  %s650_s20 = smov 8  }
  0x8a   : > { %452 = dma.vmem_to_hbm [thread:$0]  (%p929_p10), %s853_s27, 384, %s858_s8, %s308_s16, %s649_s17, %s649_s17, %s650_s20  }
  0x8b PF: > { %s336_s26 = sand.u32 1, %s629_s12   ;;  %p930_p2 = scmp.ne.s32.totalorder %s916_s25, 0 }
  0x8c   : > { %p931_p0 = scmp.ge.s32.totalorder %s641_s15, 2  ;;  %s337_s4 = scalar_lea.sflag [#allocation4], %s336_s26 }
  0x8e   : > { %p466_p4 = pnand %p931_p0, %p930_p2 }
  0x90   : > { %p467_p5 = pneg %p466_p4 }
  0x92   : > { %624 = dma.done.wait (%p467_p5), %s337_s4, 384  }
  0x93   : > { %626 = vsyncadd (%p467_p5), %s337_s4, 4294966912  ;;  %p18_p1 = scmp.ge.s32.totalorder %s696_s18, 4   ;;  %s932_s12 = smov %s633_s13 }
  0x94   : > { %s933_s13 = smov %s637_s14  ;;  %s934_s14 = smov %s708_s21 }
  0x95   : > { %s935_s15 = smov %s696_s18  ;;  %20 = sbr.rel (!%p18_p1) target bundleno = 7 (0x7), region = 91 }
  0x9a   :  { %342 = vsyncpa [#allocation3], 1 }
  0x9b   :  { %344 = vsyncpa [#allocation3 + $0x1], 1 }
  0x9c   :  { %345 = vsyncpa [#allocation4], 1 }
  0x9d   :  { %347 = vsyncpa [#allocation4 + $0x1], 1 }
  0x9e   :  { %348 = vsyncpa [#allocation5], 1 }
  0x9f   :  { %350 = vsyncpa [#allocation5 + $0x1], 1 }
  0xa0   :  { %351 = vsyncpa [#allocation6], 1 }
  0xa1   :  { %353 = vsyncpa [#allocation6 + $0x1], 1 }

</bundles_post_ra>
